<compile_context>
chip_gen: v7x
topology: tpu7x:2x2x1
jax: 0.10.0
libtpu: 0.0.40
codegen_flags: <defaults>
</compile_context>

<pallas_src>
import functools
import math

import jax
import jax.numpy as jnp
from jax import lax
from jax.experimental import pallas as pl
from jax.experimental.pallas import tpu as pltpu

LN_EPS = 1e-12      # BERT LayerNorm eps
MASK_MIN = -1e9     # additive attention-mask fill value


# ----------------------------------------------------------------------------
# tiling helpers
# ----------------------------------------------------------------------------
def _round_up(x, m):
    return (x + m - 1) // m * m


def _pick_tile(dim, target, align):
    """Tile size <= target, multiple of `align`; prefer exact divisors of dim."""
    if dim <= target:
        return _round_up(dim, align)
    for t in range(target, align - 1, -align):
        if dim % t == 0:
            return t
    return target


def _pad2(a, rows, cols):
    r, c = a.shape
    if r == rows and c == cols:
        return a
    return jnp.pad(a, ((0, rows - r), (0, cols - c)))


# ----------------------------------------------------------------------------
# Pallas kernels
# ----------------------------------------------------------------------------
def _matmul_kernel(x_ref, w_ref, b_ref, o_ref, acc_ref, *, activation):
    # x: [tm, tk], w: [tn, tk] (torch nn.Linear layout), b: [1, tn]
    k = pl.program_id(2)

    @pl.when(k == 0)
    def _():
        acc_ref[...] = jnp.zeros_like(acc_ref)

    acc_ref[...] += lax.dot_general(
        x_ref[...], w_ref[...],
        dimension_numbers=(((1,), (1,)), ((), ())),   # contract K on both (no .T)
        preferred_element_type=jnp.float32)

    @pl.when(k == pl.num_programs(2) - 1)
    def _():
        y = acc_ref[...] + b_ref[...]
        if activation == "gelu":
            y = jax.nn.gelu(y, approximate=False)     # BERT uses exact (erf) gelu
        o_ref[...] = y.astype(o_ref.dtype)


def linear(x, w, b, activation=None, tm=256, tn=512, tk=512):
    """y = x @ w.T + b  (torch nn.Linear semantics).  w: [N, K], b: [N]."""
    *lead, K = x.shape
    M = math.prod(lead)
    N = w.shape[0]
    x2 = x.reshape(M, K)

    tm_ = _pick_tile(M, tm, 8)
    tn_ = _pick_tile(N, tn, 128)
    tk_ = _pick_tile(K, tk, 128)
    Mp, Np, Kp = _round_up(M, tm_), _round_up(N, tn_), _round_up(K, tk_)

    xp = _pad2(x2, Mp, Kp)
    wp = _pad2(w, Np, Kp)
    bp = jnp.pad(b, (0, Np - N)).reshape(1, Np)

    out = pl.pallas_call(
        functools.partial(_matmul_kernel, activation=activation),
        grid=(Mp // tm_, Np // tn_, Kp // tk_),
        in_specs=[
            pl.BlockSpec((tm_, tk_), lambda i, j, k: (i, k)),
            pl.BlockSpec((tn_, tk_), lambda i, j, k: (j, k)),
            pl.BlockSpec((1, tn_), lambda i, j, k: (0, j)),
        ],
        out_specs=pl.BlockSpec((tm_, tn_), lambda i, j, k: (i, j)),
        out_shape=jax.ShapeDtypeStruct((Mp, Np), x.dtype),
        scratch_shapes=[pltpu.VMEM((tm_, tn_), jnp.float32)],
        compiler_params=pltpu.CompilerParams(
            dimension_semantics=("parallel", "parallel", "arbitrary")),
    )(xp, wp, bp)
    return out[:M, :N].reshape(*lead, N)


def _linear_add_ln_kernel(x_ref, w_ref, b_ref, r_ref, g_ref, be_ref, o_ref, acc_ref):
    # projection + residual add + LayerNorm fused epilogue.
    k = pl.program_id(1)

    @pl.when(k == 0)
    def _():
        acc_ref[...] = jnp.zeros_like(acc_ref)

    acc_ref[...] += lax.dot_general(
        x_ref[...], w_ref[...],
        dimension_numbers=(((1,), (1,)), ((), ())),
        preferred_element_type=jnp.float32)

    @pl.when(k == pl.num_programs(1) - 1)
    def _():
        y = acc_ref[...] + b_ref[...] + r_ref[...].astype(jnp.float32)
        mean = jnp.mean(y, axis=-1, keepdims=True)
        var = jnp.mean(jnp.square(y - mean), axis=-1, keepdims=True)
        yn = (y - mean) * lax.rsqrt(var + LN_EPS)
        o_ref[...] = (yn * g_ref[...] + be_ref[...]).astype(o_ref.dtype)


def linear_add_layernorm(x, w, b, residual, gamma, beta, tm=256, tk=512):
    """LayerNorm(x @ w.T + b + residual) fused; w: [H, K]."""
    *lead, K = x.shape
    M = math.prod(lead)
    H = w.shape[0]
    x2 = x.reshape(M, K)
    r2 = residual.reshape(M, H)

    tm_ = _pick_tile(M, tm, 8)
    tk_ = _pick_tile(K, tk, 128)
    Mp, Kp = _round_up(M, tm_), _round_up(K, tk_)

    xp = _pad2(x2, Mp, Kp)
    wp = _pad2(w, H, Kp)
    rp = _pad2(r2, Mp, H)

    out = pl.pallas_call(
        _linear_add_ln_kernel,
        grid=(Mp // tm_, Kp // tk_),
        in_specs=[
            pl.BlockSpec((tm_, tk_), lambda i, k: (i, k)),
            pl.BlockSpec((H, tk_), lambda i, k: (0, k)),
            pl.BlockSpec((1, H), lambda i, k: (0, 0)),
            pl.BlockSpec((tm_, H), lambda i, k: (i, 0)),
            pl.BlockSpec((1, H), lambda i, k: (0, 0)),
            pl.BlockSpec((1, H), lambda i, k: (0, 0)),
        ],
        out_specs=pl.BlockSpec((tm_, H), lambda i, k: (i, 0)),
        out_shape=jax.ShapeDtypeStruct((Mp, H), x.dtype),
        scratch_shapes=[pltpu.VMEM((tm_, H), jnp.float32)],
        compiler_params=pltpu.CompilerParams(
            dimension_semantics=("parallel", "arbitrary")),
    )(xp, wp, b.reshape(1, H), rp, gamma.reshape(1, H), beta.reshape(1, H))
    return out[:M, :H].reshape(*lead, H)


def _layernorm_kernel(x_ref, g_ref, b_ref, o_ref):
    x = x_ref[...].astype(jnp.float32)
    mean = jnp.mean(x, axis=-1, keepdims=True)
    var = jnp.mean(jnp.square(x - mean), axis=-1, keepdims=True)
    y = (x - mean) * lax.rsqrt(var + LN_EPS)
    o_ref[...] = (y * g_ref[...] + b_ref[...]).astype(o_ref.dtype)


def layernorm(x, g, b, tm=512):
    *lead, H = x.shape
    M = math.prod(lead)
    x2 = x.reshape(M, H)
    tm_ = _pick_tile(M, tm, 8)
    Mp = _round_up(M, tm_)
    xp = _pad2(x2, Mp, H)
    out = pl.pallas_call(
        _layernorm_kernel,
        grid=(Mp // tm_,),
        in_specs=[
            pl.BlockSpec((tm_, H), lambda i: (i, 0)),
            pl.BlockSpec((1, H), lambda i: (0, 0)),
            pl.BlockSpec((1, H), lambda i: (0, 0)),
        ],
        out_specs=pl.BlockSpec((tm_, H), lambda i: (i, 0)),
        out_shape=jax.ShapeDtypeStruct((Mp, H), x.dtype),
        compiler_params=pltpu.CompilerParams(dimension_semantics=("parallel",)),
    )(xp, g.reshape(1, H), b.reshape(1, H))
    return out[:M].reshape(*lead, H)


def _attention_kernel(q_ref, k_ref, v_ref, m_ref, o_ref, *, num_heads, head_dim,
                      scale):
    # per-batch tile: q/k/v [S, H] (lane-dense), additive mask [1, S].
    q = q_ref[0].astype(jnp.float32) * scale          # fold 1/sqrt(dh) into q
    k = k_ref[0].astype(jnp.float32)
    v = v_ref[0].astype(jnp.float32)
    mask = m_ref[0]                                   # [1, S], broadcasts over rows
    ctxs = []
    for h in range(num_heads):                        # static unroll over heads
        sl = slice(h * head_dim, (h + 1) * head_dim)
        q_h, k_h, v_h = q[:, sl], k[:, sl], v[:, sl]
        s = lax.dot_general(q_h, k_h, (((1,), (1,)), ((), ())),
                            preferred_element_type=jnp.float32)  # [S, S], no .T
        s = s + mask
        s = s - jnp.max(s, axis=-1, keepdims=True)
        p = jnp.exp(s)
        denom = jnp.sum(p, axis=-1, keepdims=True)
        p = p * pl.reciprocal(denom, approx=True)     # EUP reciprocal, no VPU divide
        ctxs.append(jnp.dot(p, v_h, preferred_element_type=jnp.float32))
    o_ref[0] = jnp.concatenate(ctxs, axis=-1).astype(o_ref.dtype)   # one lane-dense store


def attention(q, k, v, mask_add, num_heads):
    """q,k,v: [B, S, H]; mask_add: [B, 1, S] additive mask. Returns [B, S, H]."""
    # TODO(synk): for long sequences convert to flash-style KV-blocked online
    # softmax; full SxS scores are fine at these sizes.
    B, S, H = q.shape
    dh = H // num_heads
    scale = 1.0 / math.sqrt(dh)
    spec = pl.BlockSpec((1, S, H), lambda b: (b, 0, 0))
    return pl.pallas_call(
        functools.partial(_attention_kernel, num_heads=num_heads, head_dim=dh,
                          scale=scale),
        grid=(B,),
        in_specs=[spec, spec, spec,
                  pl.BlockSpec((1, 1, S), lambda b: (b, 0, 0))],
        out_specs=spec,
        out_shape=jax.ShapeDtypeStruct((B, S, H), q.dtype),
        compiler_params=pltpu.CompilerParams(dimension_semantics=("parallel",)),
    )(q, k, v, mask_add)


# ----------------------------------------------------------------------------
# Model assembly (glue in plain JAX; hot paths are the kernels above)
# ----------------------------------------------------------------------------
def bert_layer(x, p, mask_add, num_heads):
    B, S, H = x.shape

    qkv = linear(x, p["qkv_w"], p["qkv_b"])                     # fused QKV [B,S,3H]
    q, k, v = jnp.split(qkv, 3, axis=-1)

    ctx = attention(q, k, v, mask_add, num_heads)               # [B,S,H]

    # attn-out projection + residual + LayerNorm (fused)
    x = linear_add_layernorm(ctx, p["ao_w"], p["ao_b"], x, p["ln1_g"], p["ln1_b"])

    inter = linear(x, p["i_w"], p["i_b"], activation="gelu")    # FFN up + gelu
    # FFN down projection + residual + LayerNorm (fused)
    x = linear_add_layernorm(inter, p["o_w"], p["o_b"], x, p["ln2_g"], p["ln2_b"])
    return x


def visual_bert_forward(params, input_ids, attention_mask, visual_embeds, cfg):
    B, St = input_ids.shape
    Sv = visual_embeds.shape[1]

    # --- text embeddings (word + position + token_type); gathers are glue ---
    tok = params["word_emb"][input_ids]                              # [B,St,H]
    pos = params["pos_emb"][jnp.arange(St)][None, :, :]              # [1,St,H]
    typ = params["type_emb"][jnp.zeros((B, St), jnp.int32)]          # [B,St,H]
    text_emb = tok + pos + typ

    # --- visual embeddings: projection (Pallas) + type + position(zeros-id) ---
    vis_proj = linear(visual_embeds, params["vis_proj_w"], params["vis_proj_b"])
    vis_typ = params["vis_type_emb"][jnp.ones((B, Sv), jnp.int32)]
    vis_pos = params["vis_pos_emb"][jnp.zeros((B, Sv), jnp.int32)]
    vis_emb = vis_proj + vis_typ + vis_pos

    emb = jnp.concatenate([text_emb, vis_emb], axis=1)               # [B,S,H]
    x = layernorm(emb, params["emb_ln_g"], params["emb_ln_b"])
    # dropout: identity (eval mode)

    full_mask = jnp.concatenate(
        [attention_mask.astype(jnp.float32), jnp.ones((B, Sv), jnp.float32)],
        axis=1)
    mask_add = ((1.0 - full_mask) * MASK_MIN)[:, None, :]            # [B,1,S]

    for lp in params["layers"]:
        x = bert_layer(x, lp, mask_add, cfg["num_heads"])

    # classifier on the [CLS] (first) token of the last hidden state
    # (N=100 is padded to 128 lanes inside linear() and sliced back)
    logits = linear(x[:, 0, :], params["cls_w"], params["cls_b"])
    return logits


# ----------------------------------------------------------------------------
# Deterministic parameter init (synthetic — no checkpoint load)
# ----------------------------------------------------------------------------
def init_params(key, cfg):
    H, I, Dv = cfg["hidden"], cfg["intermediate"], cfg["visual_dim"]
    std = 0.02

    def nrm(k, shape):
        return std * jax.random.normal(k, shape, jnp.float32)

    keys = iter(jax.random.split(key, 64 + 16 * cfg["num_layers"]))
    params = {
        "word_emb": nrm(next(keys), (cfg["vocab"], H)),
        "pos_emb": nrm(next(keys), (cfg["max_pos"], H)),
        "type_emb": nrm(next(keys), (2, H)),
        "vis_proj_w": nrm(next(keys), (H, Dv)),
        "vis_proj_b": jnp.zeros((H,), jnp.float32),
        "vis_type_emb": nrm(next(keys), (2, H)),
        "vis_pos_emb": nrm(next(keys), (cfg["max_pos"], H)),
        "emb_ln_g": jnp.ones((H,), jnp.float32),
        "emb_ln_b": jnp.zeros((H,), jnp.float32),
        "cls_w": nrm(next(keys), (cfg["output_dim"], H)),
        "cls_b": jnp.zeros((cfg["output_dim"],), jnp.float32),
        "layers": [],
    }
    for _ in range(cfg["num_layers"]):
        q_w = nrm(next(keys), (H, H))
        k_w = nrm(next(keys), (H, H))
        v_w = nrm(next(keys), (H, H))
        params["layers"].append({
            # fused QKV projection weights: [3H, H] / [3H]
            "qkv_w": jnp.concatenate([q_w, k_w, v_w], axis=0),
            "qkv_b": jnp.zeros((3 * H,), jnp.float32),
            "ao_w": nrm(next(keys), (H, H)), "ao_b": jnp.zeros((H,), jnp.float32),
            "ln1_g": jnp.ones((H,), jnp.float32), "ln1_b": jnp.zeros((H,), jnp.float32),
            "i_w": nrm(next(keys), (I, H)), "i_b": jnp.zeros((I,), jnp.float32),
            "o_w": nrm(next(keys), (H, I)), "o_b": jnp.zeros((H,), jnp.float32),
            "ln2_g": jnp.ones((H,), jnp.float32), "ln2_b": jnp.zeros((H,), jnp.float32),
        })
    return params


if __name__ == "__main__":
    cfg = dict(
        vocab=100, hidden=128, num_heads=4, num_layers=2, intermediate=256,
        max_pos=32, visual_dim=64, output_dim=100,
    )
    B, St, Sv = 2, 8, 8

    root = jax.random.PRNGKey(0)
    k_par, k_ids, k_vis = jax.random.split(root, 3)

    params = init_params(k_par, cfg)

    # TODO(synk): BertTokenizer string tokenization has no Pallas/JAX
    # equivalent; deterministic token ids stand in for tokenizer output.
    input_ids = jax.random.randint(k_ids, (B, St), 0, cfg["vocab"], jnp.int32)
    attention_mask = jnp.ones((B, St), jnp.float32)
    visual_embeds = jax.random.normal(k_vis, (B, Sv, cfg["visual_dim"]), jnp.float32)

    logits = visual_bert_forward(params, input_ids, attention_mask,
                                 visual_embeds, cfg)
    logits = jax.block_until_ready(logits)
    assert logits.shape == (B, cfg["output_dim"]), logits.shape
    assert bool(jnp.all(jnp.isfinite(logits)))
    print("KERNEL_OK")
</pallas_src>

<mosaic_0001>
module attributes {stable_mosaic.version = 11 : i64} {
  func.func @_matmul_kernel(%arg0: i32, %arg1: i32, %arg2: i32, %arg3: memref<16x128xf32, #tpu.memory_space<vmem>>, %arg4: memref<128x128xf32, #tpu.memory_space<vmem>>, %arg5: memref<1x128xf32, #tpu.memory_space<vmem>>, %arg6: memref<16x128xf32, #tpu.memory_space<vmem>>, %arg7: memref<16x128xf32, #tpu.memory_space<vmem>>) attributes {dimension_semantics = [#tpu.dimension_semantics<parallel>, #tpu.dimension_semantics<parallel>, #tpu.dimension_semantics<arbitrary>], iteration_bounds = array<i64: 1, 1, 1>, scalar_prefetch = 0 : i64, scratch_operands = 1 : i64, tpu.core_type = #tpu.core_type<tc>, window_params = [{transform_indices = @transform_0, window_bounds = array<i64: 16, 128>}, {transform_indices = @transform_1, window_bounds = array<i64: 128, 128>}, {transform_indices = @transform_2, window_bounds = array<i64: 1, 128>}, {transform_indices = @transform_3, window_bounds = array<i64: 16, 128>}]} {
    %c0_i32 = arith.constant 0 : i32
    %0 = arith.cmpi eq, %arg2, %c0_i32 : i32
    %1 = arith.extui %0 : i1 to i32
    %c0_i32_0 = arith.constant 0 : i32
    %2 = arith.cmpi ne, %1, %c0_i32_0 : i32
    scf.if %2 {
      %cst_10 = arith.constant 0.000000e+00 : f32
      %12 = vector.broadcast %cst_10 : f32 to vector<16x128xf32>
      %c0_11 = arith.constant 0 : index
      %c0_12 = arith.constant 0 : index
      %13 = vector.load %arg7[%c0_11, %c0_12] : memref<16x128xf32, #tpu.memory_space<vmem>>, vector<16x128xf32>
      tpu.vector_store %arg7[%c0_11, %c0_12], %12 {strides = array<i32>} : memref<16x128xf32, #tpu.memory_space<vmem>>, vector<16x128xf32>,
    } else {
    }
    %c0 = arith.constant 0 : index
    %c0_1 = arith.constant 0 : index
    %3 = vector.load %arg7[%c0, %c0_1] : memref<16x128xf32, #tpu.memory_space<vmem>>, vector<16x128xf32>
    %c0_2 = arith.constant 0 : index
    %c0_3 = arith.constant 0 : index
    %4 = vector.load %arg3[%c0_2, %c0_3] : memref<16x128xf32, #tpu.memory_space<vmem>>, vector<16x128xf32>
    %c0_4 = arith.constant 0 : index
    %c0_5 = arith.constant 0 : index
    %5 = vector.load %arg4[%c0_4, %c0_5] : memref<128x128xf32, #tpu.memory_space<vmem>>, vector<128x128xf32>
    %cst = arith.constant dense<0.000000e+00> : vector<16x128xf32>
    %6 = tpu.matmul %4, %5, %cst {dimension_numbers = #tpu.dot_dimension_numbers<[1], [1], [0], [0], [0, 0, 1, 0], [], []>} : vector<16x128xf32>, vector<128x128xf32>, vector<16x128xf32> -> vector<16x128xf32>
    %7 = arith.addf %3, %6 : vector<16x128xf32>
    %c0_6 = arith.constant 0 : index
    %c0_7 = arith.constant 0 : index
    %8 = vector.load %arg7[%c0_6, %c0_7] : memref<16x128xf32, #tpu.memory_space<vmem>>, vector<16x128xf32>
    tpu.vector_store %arg7[%c0_6, %c0_7], %7 {strides = array<i32>} : memref<16x128xf32, #tpu.memory_space<vmem>>, vector<16x128xf32>,
    %c0_i32_8 = arith.constant 0 : i32
    %9 = arith.cmpi eq, %arg2, %c0_i32_8 : i32
    %10 = arith.extui %9 : i1 to i32
    %c0_i32_9 = arith.constant 0 : i32
    %11 = arith.cmpi ne, %10, %c0_i32_9 : i32
    scf.if %11 {
      %c0_10 = arith.constant 0 : index
      %c0_11 = arith.constant 0 : index
      %12 = vector.load %arg7[%c0_10, %c0_11] : memref<16x128xf32, #tpu.memory_space<vmem>>, vector<16x128xf32>
      %c0_12 = arith.constant 0 : index
      %c0_13 = arith.constant 0 : index
      %13 = vector.load %arg5[%c0_12, %c0_13] : memref<1x128xf32, #tpu.memory_space<vmem>>, vector<1x128xf32>
      %14 = vector.broadcast %13 : vector<1x128xf32> to vector<16x128xf32>
      %15 = arith.addf %12, %14 : vector<16x128xf32>
      %c0_14 = arith.constant 0 : index
      %c0_15 = arith.constant 0 : index
      %16 = vector.load %arg6[%c0_14, %c0_15] : memref<16x128xf32, #tpu.memory_space<vmem>>, vector<16x128xf32>
      tpu.vector_store %arg6[%c0_14, %c0_15], %15 {strides = array<i32>} : memref<16x128xf32, #tpu.memory_space<vmem>>, vector<16x128xf32>,
    } else {
    }
    return
  }
  func.func @transform_0(%arg0: i32, %arg1: i32, %arg2: i32) -> (i32, i32) {
    %c0_i32 = arith.constant 0 : i32
    return %arg0, %arg2 : i32, i32
  }
  func.func @transform_1(%arg0: i32, %arg1: i32, %arg2: i32) -> (i32, i32) {
    %c0_i32 = arith.constant 0 : i32
    return %arg1, %arg2 : i32, i32
  }
  func.func @transform_2(%arg0: i32, %arg1: i32, %arg2: i32) -> (i32, i32) {
    %c0_i32 = arith.constant 0 : i32
    %c0_i32_0 = arith.constant 0 : i32
    return %c0_i32, %arg1 : i32, i32
  }
  func.func @transform_3(%arg0: i32, %arg1: i32, %arg2: i32) -> (i32, i32) {
    %c0_i32 = arith.constant 0 : i32
    return %arg0, %arg1 : i32, i32
  }
}

</mosaic_0001>

<bundles_post_ra>
// kernel: tpu_custom_call.1
= control target key start
LH: loop header
LB: loop body
LE: loop exit
PB: predicated region body
PF: predicated region fallthrough
CT: control target
= control target key end

     0   :  { %8 = vsyncpa [#allocation4], 0  ;;  %s418_s0 = inlined_call_operand.hbm [shape: f32[16,128], index: 0, kind: input, shape index: {}]   ;;  %s419_s1 = inlined_call_operand.hbm [shape: f32[128,128], index: 1, kind: input, shape index: {}]   ;;  %s420_s2 = inlined_call_operand.vmem [shape: f32[1,128], index: 2, kind: input, shape index: {}]   ;;  %s421_s3 = inlined_call_operand.hbm [shape: f32[16,128], index: 3, kind: output, shape index: {}]  }
   0x1   :  { %9 = vsyncpa [#allocation7], 0 }
   0x2   :  { %10 = vsyncpa [#allocation5], 0  ;;  %s345_s12 = smov [#allocation3]   ;;  %s273_s16 = scalar_lea.hbm %s418_s0, 256 }
   0x3   :  { %s16_s13 = sshll.u32 %s345_s12, 4  ;;  %p274_p0 = scmp.ne.s32.totalorder %s418_s0, %s273_s16  ;;  %s17_s13 = int_to_ptr.vmem [resolvable:$true] %s16_s13 }
   0x4   :  { %p277_p1 = scmp.lt.u32.totalorder %s273_s16, %s418_s0 }
   0x6   :  { %p279_p2 = pnand %p277_p1, %p274_p0 }
   0x8   :  { %282 = shalt.err (!%p279_p2)
}
   0x9   :  { %s283_s21 = scalar_lea.vmem %s17_s13, 256  ;;  %p288_p4 = scmp.lt.s32.totalorder %s17_s13, %s17_s13 }
   0xa   :  { %p284_p3 = scmp.ne.s32.totalorder %s17_s13, %s283_s21  ;;  %p289_p5 = scmp.lt.s32.totalorder %s283_s21, %s283_s21 }
   0xc   :  { %p290_p6 = por %p289_p5, %p288_p4 }
   0xe   :  { %p291_p7 = pnand %p290_p6, %p284_p3 }
  0x10   :  { %294 = shalt.err (!%p291_p7)
}
  0x11   :  { %s346_s22 = smov 128   ;;  %s347_s23 = smov 8  }
  0x12   :  { %22 = dma.hbm_to_vmem [thread:$0]  %s418_s0, 256, %s17_s13, [#allocation4], %s346_s22, %s346_s22, %s347_s23  }
  0x13   :  { %s348_s26 = smov [#allocation6]   ;;  %s295_s30 = scalar_lea.hbm %s419_s1, 2048 }
  0x14   :  { %s28_s27 = sshll.u32 %s348_s26, 4  ;;  %p296_p8 = scmp.ne.s32.totalorder %s419_s1, %s295_s30  ;;  %s29_s27 = int_to_ptr.vmem [resolvable:$true] %s28_s27 }
  0x15   :  { %p299_p9 = scmp.lt.u32.totalorder %s295_s30, %s419_s1 }
  0x17   :  { %p301_p10 = pnand %p299_p9, %p296_p8 }
  0x19   :  { %304 = shalt.err (!%p301_p10)
}
  0x1a   :  { %s305_s8 = scalar_lea.vmem %s29_s27, 2048  ;;  %p310_p12 = scmp.lt.s32.totalorder %s29_s27, %s29_s27 }
  0x1b   :  { %p306_p11 = scmp.ne.s32.totalorder %s29_s27, %s305_s8  ;;  %p311_p13 = scmp.lt.s32.totalorder %s305_s8, %s305_s8 }
  0x1d   :  { %p312_p0 = por %p311_p13, %p310_p12 }
  0x1f   :  { %p313_p1 = pnand %p312_p0, %p306_p11 }
  0x21   :  { %316 = shalt.err (!%p313_p1)
}
  0x22   :  { %34 = dma.hbm_to_vmem [thread:$0]  %s419_s1, 2048, %s29_s27, [#allocation7], %s346_s22, %s346_s22, %s347_s23  }
  0x23   :  { %339 = dma.done.wait [#allocation4], 256  }
  0x24   :  { %340 = vsyncadd [#allocation4], 4294967040 }
  0x25   :  { %341 = dma.done.wait [#allocation7], 2048  }
  0x26   :  { %342 = vsyncadd [#allocation7], 4294965248  ;;  %v53_v0 = vld [vmem:[#allocation6] sm:$0xff]  ;;  %v54_v1 = vld [vmem:[#allocation6 + $0x8] sm:$0xff]  ;;  %s349_s11 = smov [#allocation8]  }
  0x27   :  { %v55_v2 = vld [vmem:[#allocation6 + $0x10] sm:$0xff]  ;;  %v236_v3 = vpack.c.bf16 %v54_v1, %v53_v0  ;;  %v56_v4 = vld [vmem:[#allocation6 + $0x18] sm:$0xff]  ;;  %v57_v7 = vld [vmem:[#allocation6 + $0x20] sm:$0xff]  ;;  %s169_s12 = sshll.u32 %s349_s11, 4  ;;  %s170_s12 = int_to_ptr.vmem [resolvable:$true] %s169_s12 }
  0x28   :  { %v240_v5 = vpack.c.bf16 %v56_v4, %v55_v2  ;;  %v51_v6 = vld [vmem:[#allocation3] sm:$0xff]  ;;  %v58_v8 = vld [vmem:[#allocation6 + $0x28] sm:$0xff]  ;;  %v60_v11 = vld [vmem:[#allocation6 + $0x38] sm:$0xff]  ;;  %s317_s13 = scalar_lea.vmem %s170_s12, 256  ;;  %p322_p3 = scmp.lt.s32.totalorder %s170_s12, %s170_s12 }
  0x29   :  { %237 = vmatprep.subr.bf16.mxu0 %v236_v3  ;;  %233 = vmatprep.mubr.f32.mxu0 %v51_v6  ;;  %v244_v9 = vpack.c.bf16 %v58_v8, %v57_v7  ;;  %v59_v10 = vld [vmem:[#allocation6 + $0x30] sm:$0xff]  ;;  %v61_v13 = vld [vmem:[#allocation6 + $0x40] sm:$0xff]  ;;  %v62_v14 = vld [vmem:[#allocation6 + $0x48] sm:$0xff]  ;;  %p318_p2 = scmp.ne.s32.totalorder %s170_s12, %s317_s13  ;;  %p323_p4 = scmp.lt.s32.totalorder %s317_s13, %s317_s13 }
  0x2a   :  { %239 = vmatpush3.bf16.xpose.msra.mxu0 %v236_v3  ;;  %v248_v12 = vpack.c.bf16 %v60_v11, %v59_v10  ;;  %v252_v15 = vpack.c.bf16 %v62_v14, %v61_v13  ;;  %v63_v16 = vld [vmem:[#allocation6 + $0x50] sm:$0xff]  ;;  %v64_v17 = vld [vmem:[#allocation6 + $0x58] sm:$0xff]  ;;  %v65_v19 = vld [vmem:[#allocation6 + $0x60] sm:$0xff] }
  0x2b   :  { %241 = vmatprep.subr.bf16.mxu0 %v240_v5  ;;  %v256_v18 = vpack.c.bf16 %v64_v17, %v63_v16  ;;  %v66_v20 = vld [vmem:[#allocation6 + $0x68] sm:$0xff]  ;;  %v67_v22 = vld [vmem:[#allocation6 + $0x70] sm:$0xff]  ;;  %v68_v23 = vld [vmem:[#allocation6 + $0x78] sm:$0xff]  ;;  %p324_p5 = por %p323_p4, %p322_p3 }
  0x2c   :  { %v260_v21 = vpack.c.bf16 %v66_v20, %v65_v19  ;;  %v264_v24 = vpack.c.bf16 %v68_v23, %v67_v22  ;;  %v52_v25 = vld [vmem:[#allocation3 + $0x8] sm:$0xff]  ;;  %v182_v26 = vld [vmem:[%s420_s2] ss:$0 sm:$0xff] }
  0x2d   :  { %p325_p6 = pnand %p324_p5, %p318_p2 }
  0x32   :  { %243 = vmatpush3.bf16.xpose.msra.mxu0 %v240_v5 }
  0x33   :  { %245 = vmatprep.subr.bf16.mxu0 %v244_v9 }
  0x3a   :  { %247 = vmatpush3.bf16.xpose.msra.mxu0 %v244_v9 }
  0x3b   :  { %249 = vmatprep.subr.bf16.mxu0 %v248_v12 }
  0x42   :  { %251 = vmatpush3.bf16.xpose.msra.mxu0 %v248_v12 }
  0x43   :  { %253 = vmatprep.subr.bf16.mxu0 %v252_v15 }
  0x4a   :  { %255 = vmatpush3.bf16.xpose.msra.mxu0 %v252_v15 }
  0x4b   :  { %257 = vmatprep.subr.bf16.mxu0 %v256_v18 }
  0x52   :  { %259 = vmatpush3.bf16.xpose.msra.mxu0 %v256_v18 }
  0x53   :  { %261 = vmatprep.subr.bf16.mxu0 %v260_v21 }
  0x5a   :  { %263 = vmatpush3.bf16.xpose.msra.mxu0 %v260_v21 }
  0x5b   :  { %265 = vmatprep.subr.bf16.mxu0 %v264_v24 }
  0x62   :  { %267 = vmatpush3.bf16.xpose.msra.mxu0 %v264_v24 }
  0x69   :  { %234 = vmatmul.mubr.f32.vlgmr.msra.gmra.mrb[0].mxu0 %v52_v25 }
 0x13c   :  { %v235_v27 = vpop.f32.mrb[0].mxu0 }
 0x13d   :  { %v161_v28 = vadd.f32 %v235_v27, %v182_v26  ;;  %v135_v29 = vpop.f32.mrb[1].mxu0 }
 0x13e   :  { %v160_v30 = vadd.f32 %v182_v26, %v135_v29 }
 0x13f   :  { %163 = vst [vmem:[#allocation8 + $0x8] sm:$0xff] %v161_v28 }
 0x140   :  { %162 = vst [vmem:[#allocation8] sm:$0xff] %v160_v30 }
 0x141   :  { %328 = shalt.err (!%p325_p6)
}
 0x142   :  { %s329_s2 = scalar_lea.hbm %s421_s3, 256 }
 0x143   :  { %p330_p7 = scmp.ne.s32.totalorder %s421_s3, %s329_s2  ;;  %p333_p8 = scmp.lt.u32.totalorder %s329_s2, %s421_s3 }
 0x145   :  { %p335_p9 = pnand %p333_p8, %p330_p7 }
 0x147   :  { %338 = shalt.err (!%p335_p9)
}
 0x148   :  { %175 = dma.vmem_to_hbm [thread:$0]  %s170_s12, 256, %s421_s3, [#allocation5], %s346_s22, %s346_s22, %s347_s23  }
 0x149   :  { %343 = dma.done.wait [#allocation5], 256  }
 0x14a   :  { %344 = vsyncadd [#allocation5], 4294967040 }
 0x14b   :  { %179 = vsyncpa [#allocation4], 1 }
 0x14c   :  { %180 = vsyncpa [#allocation7], 1 }
 0x14d   :  { %181 = vsyncpa [#allocation5], 1 }

</bundles_post_ra>
